<compile_context>
chip_gen: v7x
topology: tpu7x:2x2x1
jax: 0.10.0
libtpu: 0.0.40
codegen_flags: <defaults>
</compile_context>

<pallas_src>
import jax
import jax.numpy as jnp
from jax import lax
from jax.experimental import pallas as pl
from jax.experimental.pallas import tpu as pltpu


def _round_up(n, m):
    return ((n + m - 1) // m) * m


def _apply_act(y, act, out_dim):
    """Activation in f32 on the (batch, WIDTH)-padded tile."""
    if act == "identity":
        return y
    if act == "tanh":
        return jnp.tanh(y)
    if act == "relu":
        return jnp.maximum(y, 0.0)
    if act == "logistic":
        return jax.nn.sigmoid(y)
    if act == "softmax":
        # Masked softmax over the real lanes only; divide goes to the EUP.
        lane = lax.broadcasted_iota(jnp.int32, y.shape, dimension=y.ndim - 1)
        valid = lane < out_dim
        ym = jnp.where(valid, y, -1e30)
        m = jnp.max(ym, axis=-1, keepdims=True)
        e = jnp.where(valid, jnp.exp(ym - m), 0.0)
        denom = jnp.sum(e, axis=-1, keepdims=True)
        return e * pl.reciprocal(denom, approx=True)
    raise ValueError(f"unknown activation {act!r}")


# ----------------------------------------------------------------------------
# Fused kernel: the whole forward (all layers) in one kernel body.
# Inputs:  [hidden?] x  w_slab  b_slab  [scale_bias?]   -> one packed output.
# ----------------------------------------------------------------------------
def _make_fused_kernel(layer_plan, w_slices, par_lr, width, return_hidden,
                       has_hidden, has_scale):
    n_layers = len(layer_plan)

    def kernel(*refs):
        idx = 0
        h_ref = None
        if has_hidden:
            h_ref = refs[idx]; idx += 1
        x_ref = refs[idx]; idx += 1
        w_ref = refs[idx]; idx += 1
        b_ref = refs[idx]; idx += 1
        sb_ref = None
        if has_scale:
            sb_ref = refs[idx]; idx += 1
        out_ref = refs[idx]

        wdtype = w_ref.dtype

        def mm(lhs_f32, off, rows):
            # Static, tile-aligned view into the packed weight slab.
            w = w_ref[off:off + rows, :]
            return jnp.dot(lhs_f32.astype(wdtype), w,
                           preferred_element_type=jnp.float32)

        res = None
        for j, spec in enumerate(layer_plan):
            b = b_ref[j:j + 1, :]                       # (1, WIDTH) f32
            if spec["split_first"]:
                # y0 = h @ W0h_t + x @ W0x_t + b0   (no concat materialized)
                (off_h, rows_h), (off_x, rows_x) = w_slices[j]
                y = (mm(h_ref[...], off_h, rows_h)
                     + mm(x_ref[...], off_x, rows_x) + b)
            else:
                off, rows = w_slices[j]
                lhs = x_ref[...] if res is None else res
                y = mm(lhs, off, rows) + b
            y = _apply_act(y, spec["act"], spec["out_dim"])
            if spec["scale"]:
                y = par_lr * y + sb_ref[...]            # par_lr: compile-time
            res = y
            if return_hidden:
                # Lane-aligned (multiple-of-128 offset) unmasked store.
                out_ref[:, j * width:(j + 1) * width] = y
            elif j == n_layers - 1:
                out_ref[...] = y

    return kernel


# ----------------------------------------------------------------------------
# One-time builder: packs weights/biases into slabs, bakes in par_lr, returns
# a jitted fused forward.
# ----------------------------------------------------------------------------
def make_rnn_forward(params, activations, recurrent_hidden, par_lr,
                     predict_mask=None, has_hidden_state=True,
                     hidden_dim=None, return_hidden=True,
                     weight_dtype=jnp.bfloat16):
    if predict_mask is None:
        predict_mask = list(range(len(params)))
    predict_mask = list(predict_mask)
    n_layers = len(predict_mask)

    weight_dtype = jnp.dtype(weight_dtype)
    sublane = 16 if weight_dtype.itemsize == 2 else 8

    out_dims = [int(params[li][0].shape[0]) for li in predict_mask]
    width = _round_up(max(out_dims + [1]), 128)     # lane width of the dataflow

    layer_plan = []
    w_slices = []          # per-layer (offset, rows) into the packed slab
    blocks = []            # f32 blocks to stack, cast to weight_dtype at end
    bias_rows = []
    cur_rows = 0
    first_h_cols = None
    first_x_cols = None

    def add_block(w_t, rows):
        # w_t: (in, out) f32 placed top-left inside a zeroed (rows, width) block.
        nonlocal cur_rows
        blk = jnp.zeros((rows, width), jnp.float32)
        blk = blk.at[:w_t.shape[0], :w_t.shape[1]].set(w_t)
        blocks.append(blk)
        off = cur_rows
        cur_rows += rows
        return (off, rows)

    for j, li in enumerate(predict_mask):
        W, b = params[li]                      # W: (out, in) like nn.Linear
        W = jnp.asarray(W, jnp.float32)
        b = jnp.asarray(b, jnp.float32)
        out_dim = int(W.shape[0])
        in_dim = int(W.shape[1])
        split_first = bool(has_hidden_state) and j == 0
        scale = (li == recurrent_hidden - 1)
        layer_plan.append(dict(act=activations[li], split_first=split_first,
                               scale=scale, out_dim=out_dim))

        if j == 0:
            if split_first:
                assert hidden_dim is not None
                rows_h = _round_up(hidden_dim, sublane)
                rows_x = _round_up(in_dim - hidden_dim, sublane)
                sl_h = add_block(W[:, :hidden_dim].T, rows_h)  # (hid, out)
                sl_x = add_block(W[:, hidden_dim:].T, rows_x)  # (x,   out)
                w_slices.append((sl_h, sl_x))
                first_h_cols, first_x_cols = rows_h, rows_x
            else:
                rows = _round_up(in_dim, sublane)
                w_slices.append(add_block(W.T, rows))
                first_x_cols = rows
        else:
            # Full-width block: LHS is the previous (B, width) activation;
            # padded weight rows are zero so padded lanes never contribute.
            w_slices.append(add_block(W.T, width))

        bias_rows.append(jnp.zeros((width,), jnp.float32).at[:out_dim].set(b))

    w_slab = jnp.concatenate(blocks, axis=0).astype(weight_dtype)
    b_slab = (jnp.zeros((_round_up(n_layers, 8), width), jnp.float32)
              .at[:n_layers].set(jnp.stack(bias_rows, axis=0)))

    has_scale = any(spec["scale"] for spec in layer_plan)
    kernel = _make_fused_kernel(layer_plan, w_slices, float(par_lr), width,
                                return_hidden, bool(has_hidden_state), has_scale)

    vmem = pl.BlockSpec(memory_space=pltpu.MemorySpace.VMEM)

    @jax.jit
    def forward(x, hidden_state, scale_bias):
        batch = x.shape[0]
        args = []
        if has_hidden_state:
            h = hidden_state.astype(jnp.float32)
            if h.shape[1] != first_h_cols:
                h = jnp.pad(h, ((0, 0), (0, first_h_cols - h.shape[1])))
            args.append(h)
        xx = x.astype(jnp.float32)
        if xx.shape[1] != first_x_cols:
            xx = jnp.pad(xx, ((0, 0), (0, first_x_cols - xx.shape[1])))
        args.append(xx)
        args.append(w_slab)
        args.append(b_slab)
        if has_scale:
            sb = scale_bias.astype(jnp.float32).reshape(1, -1)
            if sb.shape[1] != width:
                sb = jnp.pad(sb, ((0, 0), (0, width - sb.shape[1])))
            args.append(sb)

        n_out_cols = (n_layers if return_hidden else 1) * width
        out_shape = jax.ShapeDtypeStruct((batch, n_out_cols), jnp.float32)

        # VMEM budget guard (v7x has only 64 MiB physical / 32 MiB scoped).
        io_bytes = sum(int(a.size) * a.dtype.itemsize for a in args)
        io_bytes += batch * n_out_cols * 4
        vmem_limit = int(2 * io_bytes + (n_layers + 4) * batch * width * 4
                         + (2 << 20))
        vmem_limit = max(4 << 20, min(vmem_limit, 32 << 20))

        out = pl.pallas_call(
            kernel,
            out_shape=out_shape,
            in_specs=[vmem] * len(args),
            out_specs=vmem,
            compiler_params=pltpu.CompilerParams(vmem_limit_bytes=vmem_limit),
        )(*args)

        if return_hidden:
            hidden = [out[:, j * width: j * width + out_dims[j]]
                      for j in range(n_layers)]
            return hidden[-1], hidden
        return out[:, :out_dims[-1]], None

    return forward


# ----------------------------------------------------------------------------
# Pure-JAX reference mirroring TorchRNN.forward for correctness checking.
# ----------------------------------------------------------------------------
_REF_ACTS = {
    "identity": lambda v: v,
    "tanh": jnp.tanh,
    "relu": lambda v: jnp.maximum(v, 0.0),
    "logistic": jax.nn.sigmoid,
    "softmax": lambda v: jax.nn.softmax(v, axis=-1),
}


def rnn_forward_ref(x, hidden_state, predict_mask, bias, par_lr,
                    params, activations, recurrent_hidden):
    res = (jnp.concatenate((hidden_state, x), axis=1)
           if hidden_state is not None else x)
    if predict_mask is None:
        predict_mask = list(range(len(params)))
    hidden = []
    for i in predict_mask:
        W, b = params[i]
        res = _REF_ACTS[activations[i]](res @ W.T + b)
        if i == recurrent_hidden - 1:
            res = par_lr * res + bias
        hidden.append(res)
    return res, hidden


if __name__ == "__main__":
    # Module configuration (matches TorchRNN.__init__ shapes):
    #   layer_units = [48, 32, 32, 16], 3 Linear layers, recurrent_hidden = 1
    layer_units = [48, 32, 32, 16]
    activations = ["tanh", "relu", "identity"]
    recurrent_hidden = 1

    batch = 2          # NOTE: callers should stack independent samples to >= 8
    hid_dim = layer_units[recurrent_hidden]                 # 32
    x_dim = layer_units[0] - hid_dim                        # 16

    key = jax.random.PRNGKey(0)
    keys = jax.random.split(key, 2 * len(activations) + 3)

    # Deterministic parameter init (Linear(frm, too): W (too, frm), b (too,)).
    params = []
    for li, (frm, too) in enumerate(zip(layer_units[:-1], layer_units[1:])):
        bound = 1.0 / jnp.sqrt(frm)
        W = jax.random.uniform(keys[2 * li], (too, frm), jnp.float32, -bound, bound)
        b = jax.random.uniform(keys[2 * li + 1], (too,), jnp.float32, -bound, bound)
        params.append((W, b))

    x = jax.random.normal(keys[-3], (batch, x_dim), jnp.float32)
    hidden_state = jax.random.normal(keys[-2], (batch, hid_dim), jnp.float32)
    bias = jax.random.normal(keys[-1], (1, hid_dim), jnp.float32)
    par_lr = 0.5
    predict_mask = None  # full network

    out_ref, hidden_ref = rnn_forward_ref(x, hidden_state, predict_mask, bias,
                                          par_lr, params, activations,
                                          recurrent_hidden)

    # --- Exact-math build (f32 weights) -------------------------------------
    forward_f32 = make_rnn_forward(params, activations, recurrent_hidden, par_lr,
                                   predict_mask=predict_mask,
                                   has_hidden_state=True, hidden_dim=hid_dim,
                                   return_hidden=True,
                                   weight_dtype=jnp.float32)
    out, hidden = forward_f32(x, hidden_state, bias)
    out = jax.block_until_ready(out)
    hidden = [jax.block_until_ready(h) for h in hidden]
    assert out.shape == (batch, layer_units[-1])
    assert len(hidden) == len(activations)
    assert jnp.allclose(out, out_ref, atol=1e-5, rtol=1e-5)
    for h, hr in zip(hidden, hidden_ref):
        assert jnp.allclose(h, hr, atol=1e-5, rtol=1e-5)

    # --- Fast build (bf16 MXU inputs, f32 accumulation / activations) -------
    forward_bf16 = make_rnn_forward(params, activations, recurrent_hidden, par_lr,
                                    predict_mask=predict_mask,
                                    has_hidden_state=True, hidden_dim=hid_dim,
                                    return_hidden=True,
                                    weight_dtype=jnp.bfloat16)
    out_b, hidden_b = forward_bf16(x, hidden_state, bias)
    out_b = jax.block_until_ready(out_b)
    hidden_b = [jax.block_until_ready(h) for h in hidden_b]
    assert jnp.allclose(out_b, out_ref, atol=2e-2, rtol=2e-2)
    for h, hr in zip(hidden_b, hidden_ref):
        assert jnp.allclose(h, hr, atol=2e-2, rtol=2e-2)

    # --- Inference path: single lane-dense output, no hidden list -----------
    forward_infer = make_rnn_forward(params, activations, recurrent_hidden, par_lr,
                                     predict_mask=predict_mask,
                                     has_hidden_state=True, hidden_dim=hid_dim,
                                     return_hidden=False,
                                     weight_dtype=jnp.bfloat16)
    out2, _ = forward_infer(x, hidden_state, bias)
    out2 = jax.block_until_ready(out2)
    assert jnp.allclose(out2, out_ref, atol=2e-2, rtol=2e-2)

    print("KERNEL_OK")
</pallas_src>

<mosaic_0001>
module attributes {stable_mosaic.version = 11 : i64} {
  func.func @kernel(%arg0: memref<2x32xf32, #tpu.memory_space<vmem>>, %arg1: memref<2x16xf32, #tpu.memory_space<vmem>>, %arg2: memref<304x128xf32, #tpu.memory_space<vmem>>, %arg3: memref<8x128xf32, #tpu.memory_space<vmem>>, %arg4: memref<1x128xf32, #tpu.memory_space<vmem>>, %arg5: memref<2x384xf32, #tpu.memory_space<vmem>>) attributes {dimension_semantics = [], scalar_prefetch = 0 : i64, scratch_operands = 0 : i64, tpu.core_type = #tpu.core_type<tc>} {
    %c0 = arith.constant 0 : index
    %c0_0 = arith.constant 0 : index
    %0 = vector.load %arg3[%c0, %c0_0] : memref<8x128xf32, #tpu.memory_space<vmem>>, vector<1x128xf32>
    %c0_1 = arith.constant 0 : index
    %c0_2 = arith.constant 0 : index
    %1 = vector.load %arg0[%c0_1, %c0_2] : memref<2x32xf32, #tpu.memory_space<vmem>>, vector<2x32xf32>
    %c0_3 = arith.constant 0 : index
    %c0_4 = arith.constant 0 : index
    %2 = vector.load %arg2[%c0_3, %c0_4] : memref<304x128xf32, #tpu.memory_space<vmem>>, vector<32x128xf32>
    %cst = arith.constant dense<0.000000e+00> : vector<2x128xf32>
    %3 = tpu.matmul %1, %2, %cst {dimension_numbers = #tpu.dot_dimension_numbers<[1], [0], [0], [1], [0, 0, 1, 1], [], []>} : vector<2x32xf32>, vector<32x128xf32>, vector<2x128xf32> -> vector<2x128xf32>
    %c0_5 = arith.constant 0 : index
    %c0_6 = arith.constant 0 : index
    %4 = vector.load %arg1[%c0_5, %c0_6] : memref<2x16xf32, #tpu.memory_space<vmem>>, vector<2x16xf32>
    %c32 = arith.constant 32 : index
    %c0_7 = arith.constant 0 : index
    %5 = vector.load %arg2[%c32, %c0_7] : memref<304x128xf32, #tpu.memory_space<vmem>>, vector<16x128xf32>
    %cst_8 = arith.constant dense<0.000000e+00> : vector<2x128xf32>
    %6 = tpu.matmul %4, %5, %cst_8 {dimension_numbers = #tpu.dot_dimension_numbers<[1], [0], [0], [1], [0, 0, 1, 1], [], []>} : vector<2x16xf32>, vector<16x128xf32>, vector<2x128xf32> -> vector<2x128xf32>
    %7 = arith.addf %3, %6 : vector<2x128xf32>
    %8 = vector.broadcast %0 : vector<1x128xf32> to vector<2x128xf32>
    %9 = arith.addf %7, %8 : vector<2x128xf32>
    %10 = math.tanh %9 : vector<2x128xf32>
    %cst_9 = arith.constant 5.000000e-01 : f32
    %11 = vector.broadcast %cst_9 : f32 to vector<2x128xf32>
    %12 = arith.mulf %11, %10 : vector<2x128xf32>
    %c0_10 = arith.constant 0 : index
    %c0_11 = arith.constant 0 : index
    %13 = vector.load %arg4[%c0_10, %c0_11] : memref<1x128xf32, #tpu.memory_space<vmem>>, vector<1x128xf32>
    %14 = vector.broadcast %13 : vector<1x128xf32> to vector<2x128xf32>
    %15 = arith.addf %12, %14 : vector<2x128xf32>
    %c0_12 = arith.constant 0 : index
    %c0_13 = arith.constant 0 : index
    %16 = vector.load %arg5[%c0_12, %c0_13] : memref<2x384xf32, #tpu.memory_space<vmem>>, vector<2x128xf32>
    tpu.vector_store %arg5[%c0_12, %c0_13], %15 {strides = array<i32>} : memref<2x384xf32, #tpu.memory_space<vmem>>, vector<2x128xf32>,
    %c1 = arith.constant 1 : index
    %c0_14 = arith.constant 0 : index
    %17 = vector.load %arg3[%c1, %c0_14] : memref<8x128xf32, #tpu.memory_space<vmem>>, vector<1x128xf32>
    %c48 = arith.constant 48 : index
    %c0_15 = arith.constant 0 : index
    %18 = vector.load %arg2[%c48, %c0_15] : memref<304x128xf32, #tpu.memory_space<vmem>>, vector<128x128xf32>
    %cst_16 = arith.constant dense<0.000000e+00> : vector<2x128xf32>
    %19 = tpu.matmul %15, %18, %cst_16 {dimension_numbers = #tpu.dot_dimension_numbers<[1], [0], [0], [1], [0, 0, 1, 1], [], []>} : vector<2x128xf32>, vector<128x128xf32>, vector<2x128xf32> -> vector<2x128xf32>
    %20 = vector.broadcast %17 : vector<1x128xf32> to vector<2x128xf32>
    %21 = arith.addf %19, %20 : vector<2x128xf32>
    %cst_17 = arith.constant 0.000000e+00 : f32
    %22 = vector.broadcast %cst_17 : f32 to vector<2x128xf32>
    %23 = arith.maximumf %21, %22 : vector<2x128xf32>
    %c0_18 = arith.constant 0 : index
    %c128 = arith.constant 128 : index
    %24 = vector.load %arg5[%c0_18, %c128] : memref<2x384xf32, #tpu.memory_space<vmem>>, vector<2x128xf32>
    tpu.vector_store %arg5[%c0_18, %c128], %23 {strides = array<i32>} : memref<2x384xf32, #tpu.memory_space<vmem>>, vector<2x128xf32>,
    %c2 = arith.constant 2 : index
    %c0_19 = arith.constant 0 : index
    %25 = vector.load %arg3[%c2, %c0_19] : memref<8x128xf32, #tpu.memory_space<vmem>>, vector<1x128xf32>
    %c176 = arith.constant 176 : index
    %c0_20 = arith.constant 0 : index
    %26 = vector.load %arg2[%c176, %c0_20] : memref<304x128xf32, #tpu.memory_space<vmem>>, vector<128x128xf32>
    %cst_21 = arith.constant dense<0.000000e+00> : vector<2x128xf32>
    %27 = tpu.matmul %23, %26, %cst_21 {dimension_numbers = #tpu.dot_dimension_numbers<[1], [0], [0], [1], [0, 0, 1, 1], [], []>} : vector<2x128xf32>, vector<128x128xf32>, vector<2x128xf32> -> vector<2x128xf32>
    %28 = vector.broadcast %25 : vector<1x128xf32> to vector<2x128xf32>
    %29 = arith.addf %27, %28 : vector<2x128xf32>
    %c0_22 = arith.constant 0 : index
    %c256 = arith.constant 256 : index
    %30 = vector.load %arg5[%c0_22, %c256] : memref<2x384xf32, #tpu.memory_space<vmem>>, vector<2x128xf32>
    tpu.vector_store %arg5[%c0_22, %c256], %29 {strides = array<i32>} : memref<2x384xf32, #tpu.memory_space<vmem>>, vector<2x128xf32>,
    return
  }
}

</mosaic_0001>

<bundles_post_ra>
// kernel: forward.1
= control target key start
LH: loop header
LB: loop body
LE: loop exit
PB: predicated region body
PF: predicated region fallthrough
CT: control target
= control target key end

     0   :  { %10 = vsyncpa [#allocation3], 0  ;;  %s775_s0 = inlined_call_operand.vmem [shape: f32[2,32], index: 0, kind: input, shape index: {}]   ;;  %s776_s1 = inlined_call_operand.hbm [shape: f32[2,16], index: 1, kind: input, shape index: {}]   ;;  %s777_s2 = inlined_call_operand.hbm [shape: f32[304,128], index: 2, kind: input, shape index: {}]   ;;  %s778_s3 = inlined_call_operand.vmem [shape: f32[8,128], index: 3, kind: input, shape index: {}]   ;;  %s779_s4 = inlined_call_operand.vmem [shape: f32[1,128], index: 4, kind: input, shape index: {}]   ;;  %s780_s5 = inlined_call_operand.vmem [shape: f32[2,384], index: 5, kind: output, shape index: {}]  }
   0x1   :  { %11 = vsyncpa [#allocation5], 0  ;;  %s660_s18 = smov [#allocation2]   ;;  %s661_s20 = smov [#allocation4]  }
   0x2   :  { %s20_s19 = sshll.u32 %s660_s18, 4  ;;  %s29_s21 = sshll.u32 %s661_s20, 4  ;;  %s21_s19 = int_to_ptr.vmem [resolvable:$true] %s20_s19  ;;  %s697_s21 = int_to_ptr.vmem [resolvable:$true] %s29_s21 }
   0x3   :  { %s612_s24 = scalar_lea.hbm %s776_s1, 32 }
   0x4   :  { %p613_p0 = scmp.ne.s32.totalorder %s776_s1, %s612_s24  ;;  %p616_p1 = scmp.lt.u32.totalorder %s612_s24, %s776_s1 }
   0x6   :  { %p618_p2 = pnand %p616_p1, %p613_p0 }
   0x8   :  { %621 = shalt.err (!%p618_p2)
}
   0x9   :  { %s622_s29 = scalar_lea.vmem %s21_s19, 32  ;;  %p627_p4 = scmp.lt.s32.totalorder %s21_s19, %s21_s19 }
   0xa   :  { %p623_p3 = scmp.ne.s32.totalorder %s21_s19, %s622_s29  ;;  %p628_p5 = scmp.lt.s32.totalorder %s622_s29, %s622_s29 }
   0xc   :  { %p629_p6 = por %p628_p5, %p627_p4 }
   0xe   :  { %p630_p7 = pnand %p629_p6, %p623_p3 }
  0x10   :  { %633 = shalt.err (!%p630_p7)
}
  0x11   :  { %23 = dma.hbm_to_vmem [thread:$0]  %s776_s1, 32, %s21_s19, [#allocation3]  }
  0x12   :  { %s634_s9 = scalar_lea.hbm %s777_s2, 4864 }
  0x13   :  { %p635_p8 = scmp.ne.s32.totalorder %s777_s2, %s634_s9  ;;  %p638_p9 = scmp.lt.u32.totalorder %s634_s9, %s777_s2 }
  0x15   :  { %p640_p10 = pnand %p638_p9, %p635_p8 }
  0x17   :  { %643 = shalt.err (!%p640_p10)
}
  0x18   :  { %s644_s14 = scalar_lea.vmem %s697_s21, 4864  ;;  %p649_p12 = scmp.lt.s32.totalorder %s697_s21, %s697_s21 }
  0x19   :  { %p645_p11 = scmp.ne.s32.totalorder %s697_s21, %s644_s14  ;;  %p650_p13 = scmp.lt.s32.totalorder %s644_s14, %s644_s14 }
  0x1b   :  { %p651_p0 = por %p650_p13, %p649_p12 }
  0x1d   :  { %p652_p1 = pnand %p651_p0, %p645_p11 }
  0x1f   :  { %655 = shalt.err (!%p652_p1)
}
  0x20   :  { %s662_s1 = smov 128   ;;  %s663_s15 = smov 8  }
  0x21   :  { %35 = dma.hbm_to_vmem [thread:$0]  %s777_s2, 4864, %s697_s21, [#allocation5], %s662_s1, %s662_s1, %s663_s15  }
  0x22   :  { %656 = dma.done.wait [#allocation3], 32  }
  0x23   :  { %657 = vsyncadd [#allocation3], 4294967264 }
  0x24   :  { %658 = dma.done.wait [#allocation5], 4864  }
  0x25   :  { %659 = vsyncadd [#allocation5], 4294962432  ;;  %v664_v0 = vmov 0.0|0.0   ;;  %vm665_vm0 = vmmov 0   ;;  %v666_v1 = vmov 0.0   ;;  %v48_v2 = vld [vmem:[#allocation4] sm:$0xff] }
  0x26   :  { %549 = vmatprep.subr.bf16.mxu1 %v664_v0  ;;  %546 = vmatprep.subr.bf16.mxu0 %v664_v0  ;;  %v49_v3 = vld [vmem:[#allocation4 + $0x8] sm:$0xff]  ;;  %v53_v4 = vld [vmem:[#allocation4 + $0x20] sm:$0xff]  ;;  %v50_v7 = vld [vmem:[#allocation4 + $0x10] sm:$0xff]  ;;  %vm55_vm1 = vcmask 130048   ;;  %vm129_vm2 = vcmask 261120  }
  0x27   :  { %462 = vmatprep.mubr.msk.f32.mxu0 %vm665_vm0, %v666_v1  ;;  %473 = vmatprep.mubr.msk.f32.mxu1 %vm665_vm0, %v666_v1  ;;  %v550_v5 = vpack.c.bf16 %v49_v3, %v48_v2  ;;  %v54_v6 = vld [vmem:[#allocation4 + $0x28] sm:$0xff]  ;;  %v51_v8 = vld [vmem:[#allocation4 + $0x18] sm:$0xff]  ;;  %v220_v10 = vld [vmem:[#allocation4 + $0x30] sm:$0xff] }
  0x28   :  { %v547_v9 = vpack.c.bf16 %v54_v6, %v53_v4  ;;  %v553_v11 = vpack.c.bf16 %v51_v8, %v50_v7  ;;  %v221_v12 = vld [vmem:[#allocation4 + $0x38] sm:$0xff]  ;;  %v222_v15 = vld [vmem:[#allocation4 + $0x40] sm:$0xff]  ;;  %v223_v16 = vld [vmem:[#allocation4 + $0x48] sm:$0xff] }
  0x29   :  { %551 = vmatpush3.bf16.msra.mxu1 %v550_v5  ;;  %v52_v13 = vld [vmem:[#allocation2] sm:$0x3]  ;;  %v556_v14 = vpack.c.bf16 %v221_v12, %v220_v10  ;;  %v559_v18 = vpack.c.bf16 %v223_v16, %v222_v15  ;;  %v224_v19 = vld [vmem:[#allocation4 + $0x50] sm:$0xff]  ;;  %v226_v22 = vld [vmem:[#allocation4 + $0x60] sm:$0xff] }
  0x2a   :  { %548 = vmatpush3.bf16.msra.mxu0 %v547_v9  ;;  %552 = vmatprep.subr.bf16.mxu1 %v664_v0  ;;  %v47_v17 = vld [vmem:[%s775_s0] sm:$0x3]  ;;  %v227_v23 = vld [vmem:[#allocation4 + $0x68] sm:$0xff]  ;;  %v228_v25 = vld [vmem:[#allocation4 + $0x70] sm:$0xff] }
  0x2b   :  { %555 = vmatprep.subr.bf16.mxu0 %v664_v0  ;;  %v225_v20 = vld [vmem:[#allocation4 + $0x58] sm:$0xff]  ;;  %v565_v24 = vpack.c.bf16 %v227_v23, %v226_v22  ;;  %v230_v28 = vld [vmem:[#allocation4 + $0x80] sm:$0xff]  ;;  %v231_v29 = vld [vmem:[#allocation4 + $0x88] sm:$0xff] }
  0x2c   :  { %v562_v21 = vpack.c.bf16 %v225_v20, %v224_v19  ;;  %v229_v26 = vld [vmem:[#allocation4 + $0x78] sm:$0xff]  ;;  %v571_v30 = vpack.c.bf16 %v231_v29, %v230_v28  ;;  %v232_v31 = vld [vmem:[#allocation4 + $0x90] sm:$0xff]  ;;  %v234_v34 = vld [vmem:[#allocation4 + $0xa0] sm:$0xff] }
  0x2d   :  { %554 = vmatpush3.bf16.msra.mxu1 %v553_v11  ;;  %463 = vmatmul.mubr.msk.f32.vlgmr.msra.gmra.mrb[0].mxu0 %vm55_vm1, %v52_v13  ;;  %v568_v27 = vpack.c.bf16 %v229_v26, %v228_v25  ;;  %v233_v32 = vld [vmem:[#allocation4 + $0x98] sm:$0xff]  ;;  %v235_v35 = vld [vmem:[#allocation4 + $0xa8] sm:$0xff]  ;;  %v313_v37 = vld [vmem:[#allocation4 + $0xb0] sm:$0xff] }
  0x2e   :  { %557 = vmatpush3.bf16.msra.mxu0 %v556_v14  ;;  %508 = vmatprep.mubr.msk.f32.mxu0 %vm665_vm0, %v666_v1  ;;  %v574_v33 = vpack.c.bf16 %v233_v32, %v232_v31  ;;  %v577_v36 = vpack.c.bf16 %v235_v35, %v234_v34  ;;  %v314_v38 = vld [vmem:[#allocation4 + $0xb8] sm:$0xff]  ;;  %v315_v39 = vld [vmem:[#allocation4 + $0xc0] sm:$0xff]  ;;  %v316_v41 = vld [vmem:[#allocation4 + $0xc8] sm:$0xff] }
  0x2f   :  { %558 = vmatprep.subr.bf16.mxu0 %v664_v0  ;;  %579 = vmatprep.subr.bf16.mxu1 %v664_v0  ;;  %v580_v40 = vpack.c.bf16 %v314_v38, %v313_v37  ;;  %v583_v42 = vpack.c.bf16 %v316_v41, %v315_v39  ;;  %v317_v43 = vld [vmem:[#allocation4 + $0xd0] sm:$0xff]  ;;  %v318_v44 = vld [vmem:[#allocation4 + $0xd8] sm:$0xff]  ;;  %v319_v46 = vld [vmem:[#allocation4 + $0xe0] sm:$0xff] }
  0x30   :  { %474 = vmatmul.mubr.msk.f32.vlgmr.msra.gmra.mrb[0].mxu1 %vm129_vm2, %v47_v17  ;;  %v586_v45 = vpack.c.bf16 %v318_v44, %v317_v43  ;;  %v320_v47 = vld [vmem:[#allocation4 + $0xe8] sm:$0xff]  ;;  %v321_v49 = vld [vmem:[#allocation4 + $0xf0] sm:$0xff]  ;;  %v322_v50 = vld [vmem:[#allocation4 + $0xf8] sm:$0xff] }
  0x31   :  { %543 = vmatprep.mubr.msk.f32.mxu1 %vm665_vm0, %v666_v1  ;;  %581 = vmatpush3.bf16.msra.mxu1 %v580_v40  ;;  %v589_v48 = vpack.c.bf16 %v320_v47, %v319_v46  ;;  %v592_v51 = vpack.c.bf16 %v322_v50, %v321_v49  ;;  %v323_v52 = vld [vmem:[#allocation4 + $0x100] sm:$0xff]  ;;  %v324_v53 = vld [vmem:[#allocation4 + $0x108] sm:$0xff]  ;;  %v325_v55 = vld [vmem:[#allocation4 + $0x110] sm:$0xff] }
  0x32   :  { %560 = vmatpush3.bf16.msra.mxu0 %v559_v18  ;;  %582 = vmatprep.subr.bf16.mxu1 %v664_v0  ;;  %v595_v54 = vpack.c.bf16 %v324_v53, %v323_v52  ;;  %v326_v56 = vld [vmem:[#allocation4 + $0x118] sm:$0xff]  ;;  %v328_v6 = vld [vmem:[#allocation4 + $0x128] sm:$0xff]  ;;  %v415_v13 = vld [vmem:[%s778_s3 + $0x2] ss:$0 sm:$0xff] }
  0x33   :  { %561 = vmatprep.subr.bf16.mxu0 %v664_v0  ;;  %v598_v57 = vpack.c.bf16 %v326_v56, %v325_v55  ;;  %v412_v60 = vld [vmem:[%s778_s3] ss:$0 sm:$0xff]  ;;  %v414_v8 = vld [vmem:[%s778_s3 + $0x1] ss:$0 sm:$0xff] }
  0x34   :  { %v413_v3 = vld [vmem:[%s779_s4] ss:$0 sm:$0xff] }
  0x35   :  { %584 = vmatpush3.bf16.msra.mxu1 %v583_v42 }
  0x36   :  { %563 = vmatpush3.bf16.msra.mxu0 %v562_v21  ;;  %585 = vmatprep.subr.bf16.mxu1 %v664_v0 }
  0x37   :  { %564 = vmatprep.subr.bf16.mxu0 %v664_v0 }
  0x39   :  { %587 = vmatpush3.bf16.msra.mxu1 %v586_v45 }
  0x3a   :  { %566 = vmatpush3.bf16.msra.mxu0 %v565_v24  ;;  %588 = vmatprep.subr.bf16.mxu1 %v664_v0 }
  0x3b   :  { %567 = vmatprep.subr.bf16.mxu0 %v664_v0 }
  0x3d   :  { %590 = vmatpush3.bf16.msra.mxu1 %v589_v48 }
  0x3e   :  { %569 = vmatpush3.bf16.msra.mxu0 %v568_v27  ;;  %591 = vmatprep.subr.bf16.mxu1 %v664_v0 }
  0x3f   :  { %570 = vmatprep.subr.bf16.mxu0 %v664_v0 }
  0x41   :  { %593 = vmatpush3.bf16.msra.mxu1 %v592_v51 }
  0x42   :  { %572 = vmatpush3.bf16.msra.mxu0 %v571_v30  ;;  %594 = vmatprep.subr.bf16.mxu1 %v664_v0 }
  0x43   :  { %573 = vmatprep.subr.bf16.mxu0 %v664_v0 }
  0x45   :  { %596 = vmatpush3.bf16.msra.mxu1 %v595_v54 }
  0x46   :  { %575 = vmatpush3.bf16.msra.mxu0 %v574_v33  ;;  %597 = vmatprep.subr.bf16.mxu1 %v664_v0 }
  0x47   :  { %576 = vmatprep.subr.bf16.mxu0 %v664_v0 }
  0x49   :  { %599 = vmatpush3.bf16.msra.mxu1 %v598_v57 }
  0x4a   :  { %578 = vmatpush3.bf16.msra.mxu0 %v577_v36  ;;  %600 = vmatprep.subr.bf16.mxu1 %v664_v0  ;;  %v327_v0 = vld [vmem:[#allocation4 + $0x120] sm:$0xff] }
  0x4b   :  { %v601_v7 = vpack.c.bf16 %v328_v6, %v327_v0 }
  0x4d   :  { %602 = vmatpush3.bf16.msra.mxu1 %v601_v7 }
 0x100   :  { %v125_v58 = vpop.f32.mrb[0].mxu0 }
 0x101   :  { %v464_v59 = vpop.f32.mrb[1].mxu0 }
 0x103   :  { %v199_v61 = vpop.f32.mrb[0].mxu1 }
 0x104   :  { %v200_v62 = vadd.f32 %v199_v61, %v125_v58  ;;  %v475_v63 = vpop.f32.mrb[1].mxu1 }
 0x106   :  { %v207_v1 = vadd.f32 %v412_v60, %v200_v62 }
 0x108   :  { %610 = vtanh.f32 %v207_v1 }
 0x112   :  { %v611_v2 = vpop.eup %610 }
 0x113   :  { %v209_v4 = vmul.f32 0.5, %v611_v2 }
 0x115   :  { %v217_v5 = vadd.f32 %v413_v3, %v209_v4 }
 0x117   :  { %218 = vst [vmem:[%s780_s5] sm:$0x3] %v217_v5  ;;  %509 = vmatmul.mubr.f32.vlgmr.msra.gmra.mrb[2].mxu0 %v217_v5 }
 0x1ea   :  { %v306_v9 = vpop.f32.mrb[2].mxu0 }
 0x1eb   :  { %v307_v10 = vadd.f32 %v414_v8, %v306_v9  ;;  %v510_v11 = vpop.f32.mrb[3].mxu0 }
 0x1ed   :  { %v310_v12 = vmax.f32 %v307_v10, 0.0 }
 0x1ef   :  { %311 = vst [vmem:[%s780_s5 + $0x2] sm:$0x3] %v310_v12  ;;  %544 = vmatmul.mubr.f32.vlgmr.msra.gmra.mrb[2].mxu1 %v310_v12 }
 0x2c2   :  { %v399_v14 = vpop.f32.mrb[2].mxu1 }
 0x2c3   :  { %v400_v15 = vadd.f32 %v415_v13, %v399_v14  ;;  %v545_v16 = vpop.f32.mrb[3].mxu1 }
 0x2c5   :  { %403 = vst [vmem:[%s780_s5 + $0x4] sm:$0x3] %v400_v15 }
 0x2c6   :  { %408 = vsyncpa [#allocation3], 1 }
 0x2c7   :  { %409 = vsyncpa [#allocation5], 1 }

</bundles_post_ra>
